<compile_context>
chip_gen: v6e
topology: v6e:2x2x1
jax: 0.10.0
libtpu: 0.0.40
codegen_flags: <defaults>
</compile_context>

<pallas_src>
import jax
import jax.numpy as jnp
from jax.experimental import pallas as pl
from jax.experimental.pallas import tpu as pltpu


LANES = 128                  # vreg lane width: last block dim stays lane-dense
SUBLANES = 8                 # sublane granularity: row-tile must be a multiple of 8
MIN_PALLAS_ELEMS = 1 << 21   # ~2M elems: below this, plain fused XLA wins (per-call overhead)
MAX_TILE_ROWS = 4096         # 4096*128*4B = 2 MiB block; in+out double-buffered ~8 MiB VMEM
MIN_GRID_BLOCKS = 4          # keep >= 4 grid blocks so v7x's two TensorCores both get work


def _lr_kernel(w_ref, b_ref, x_ref, o_ref):
    # w_ref / b_ref: (1,) f32 scalar-prefetch refs in SMEM (no VMEM (1,1) tiles).
    # x_ref / o_ref: (tile_rows, 128) lane-dense VMEM tiles.
    # Pure streaming VPU FMA — no MXU, no transposes, no masked 1-lane stores.
    w = w_ref[0]
    b = b_ref[0]
    x = x_ref[...].astype(jnp.float32)   # per-vreg upcast; HBM traffic stays native dtype
    o_ref[...] = (x * w + b).astype(o_ref.dtype)


def _pick_tile_rows(rows, tile_rows):
    """Sublane-aligned row tile, capped so the parallel grid keeps several blocks."""
    if rows <= SUBLANES:
        return rows  # single full-extent block (block dim == array dim is allowed)
    t = min(tile_rows, MAX_TILE_ROWS, pl.cdiv(rows, MIN_GRID_BLOCKS))
    t = max(SUBLANES, (t // SUBLANES) * SUBLANES)
    return min(t, rows)


def _lr_pallas_rows(x2d, w, b, tile_rows):
    """Run the lane-dense Pallas kernel on an already (rows, 128)-shaped slab."""
    rows = x2d.shape[0]
    tr = _pick_tile_rows(rows, tile_rows)
    n_blocks = pl.cdiv(rows, tr)   # last block may be ragged; Pallas masks edge writes

    w_s = w.reshape(1).astype(jnp.float32)   # scalar weight -> SMEM
    b_s = b.reshape(1).astype(jnp.float32)   # scalar bias   -> SMEM

    return pl.pallas_call(
        _lr_kernel,
        out_shape=jax.ShapeDtypeStruct((rows, LANES), x2d.dtype),
        grid_spec=pltpu.PrefetchScalarGridSpec(
            num_scalar_prefetch=2,           # w, b live in SMEM; no per-step HBM DMAs
            grid=(n_blocks,),
            in_specs=[
                pl.BlockSpec((tr, LANES), lambda i, w_r, b_r: (i, 0)),
            ],
            out_specs=pl.BlockSpec((tr, LANES), lambda i, w_r, b_r: (i, 0)),
        ),
        compiler_params=pltpu.CompilerParams(
            # Independent batch tiles: shard the grid across TensorCores (v7x).
            dimension_semantics=("parallel",),
            # 2 MiB blocks double-buffered (~8 MiB) fit the default scoped VMEM on
            # v5e/v6e/v7x; only set vmem_limit_bytes if MAX_TILE_ROWS is pushed past ~4096.
        ),
    )(w_s, b_s, x2d)


def lr_forward(x, w, b, *, tile_rows=MAX_TILE_ROWS, force_pallas=False):
    """Forward pass of LR: y = x @ W^T + b  (== x * w + b since K = N_out = 1).

    x: (N, 1), w: (1, 1), b: (1,)  ->  (N, 1) in x.dtype.
    Small/medium batches stay in plain XLA — a fused elementwise affine is already at
    HBM roofline, so Pallas only makes sense for very large N (or when force_pallas).
    """
    n = x.shape[0]
    w_scalar = w.reshape(())
    b_scalar = b.reshape(())

    if not force_pallas and n < MIN_PALLAS_ELEMS:
        return (x * w_scalar + b_scalar).astype(x.dtype)

    rows, tail = divmod(n, LANES)
    if rows == 0:
        return (x * w_scalar + b_scalar).astype(x.dtype)

    x_flat = x.reshape(-1)

    if tail == 0:
        # Fast path: (N,1) -> (rows,128) is a metadata-only reshape; zero extra copies.
        out2d = _lr_pallas_rows(x_flat.reshape(rows, LANES), w, b, tile_rows)
        return out2d.reshape(n, 1)

    # Ragged path: Pallas on the 128-divisible prefix, plain XLA on the tiny tail.
    prefix = rows * LANES
    out_prefix = _lr_pallas_rows(
        x_flat[:prefix].reshape(rows, LANES), w, b, tile_rows
    ).reshape(prefix)
    out_tail = (x_flat[prefix:] * w_scalar + b_scalar).astype(x.dtype)
    return jnp.concatenate([out_prefix, out_tail]).reshape(n, 1)


if __name__ == "__main__":
    key = jax.random.PRNGKey(0)
    kx, kw, kb = jax.random.split(key, 3)

    # nn.Linear-shaped parameters: W (out_features=1, in_features=1), b (1,)
    w = jax.random.normal(kw, (1, 1), dtype=jnp.float32) * 0.5
    b = jax.random.normal(kb, (1,), dtype=jnp.float32) * 0.1

    # Exercise both paths at small, deterministic sizes:
    #   N=2048 -> divisible-by-128 fast path (2 grid blocks at tile_rows=8),
    #   N=2500 -> ragged tail path (19 full rows + 68-element XLA tail, ragged edge block).
    for N in (2048, 2500):
        x = jax.random.normal(kx, (N, 1), dtype=jnp.float32)
        out = lr_forward(x, w, b, tile_rows=8, force_pallas=True)
        jax.block_until_ready(out)

        ref = x @ w.T + b   # pure-JAX reference of nn.Linear semantics
        assert out.shape == (N, 1)
        assert jnp.allclose(out, ref, atol=1e-6, rtol=1e-6), f"mismatch vs reference (N={N})"

    print("KERNEL_OK")
</pallas_src>

<mosaic_0001>
module attributes {stable_mosaic.version = 11 : i64} {
  func.func @_lr_kernel(%arg0: i32, %arg1: memref<1xf32, #tpu.memory_space<smem>>, %arg2: memref<1xf32, #tpu.memory_space<smem>>, %arg3: memref<8x128xf32, #tpu.memory_space<vmem>>, %arg4: memref<8x128xf32, #tpu.memory_space<vmem>>) attributes {dimension_semantics = [#tpu.dimension_semantics<parallel>], iteration_bounds = array<i64: 2>, scalar_prefetch = 2 : i64, scratch_operands = 0 : i64, tpu.core_type = #tpu.core_type<tc>, window_params = [{transform_indices = @transform_0, window_bounds = array<i64: 8, 128>}, {transform_indices = @transform_1, window_bounds = array<i64: 8, 128>}]} {
    %c0 = arith.constant 0 : index
    %0 = memref.load %arg1[%c0] : memref<1xf32, #tpu.memory_space<smem>>
    %c0_0 = arith.constant 0 : index
    %1 = memref.load %arg2[%c0_0] : memref<1xf32, #tpu.memory_space<smem>>
    %c0_1 = arith.constant 0 : index
    %c0_2 = arith.constant 0 : index
    %2 = vector.load %arg3[%c0_1, %c0_2] : memref<8x128xf32, #tpu.memory_space<vmem>>, vector<8x128xf32>
    %3 = vector.broadcast %0 : f32 to vector<8x128xf32>
    %4 = arith.mulf %2, %3 : vector<8x128xf32>
    %5 = vector.broadcast %1 : f32 to vector<8x128xf32>
    %6 = arith.addf %4, %5 : vector<8x128xf32>
    %c0_3 = arith.constant 0 : index
    %c0_4 = arith.constant 0 : index
    %7 = vector.load %arg4[%c0_3, %c0_4] : memref<8x128xf32, #tpu.memory_space<vmem>>, vector<8x128xf32>
    tpu.vector_store %arg4[%c0_3, %c0_4], %6 {strides = array<i32>} : memref<8x128xf32, #tpu.memory_space<vmem>>, vector<8x128xf32>,
    return
  }
  func.func @transform_0(%arg0: i32, %arg1: memref<1xf32, #tpu.memory_space<smem>>, %arg2: memref<1xf32, #tpu.memory_space<smem>>) -> (i32, i32) {
    %c0_i32 = arith.constant 0 : i32
    %c0_i32_0 = arith.constant 0 : i32
    return %arg0, %c0_i32 : i32, i32
  }
  func.func @transform_1(%arg0: i32, %arg1: memref<1xf32, #tpu.memory_space<smem>>, %arg2: memref<1xf32, #tpu.memory_space<smem>>) -> (i32, i32) {
    %c0_i32 = arith.constant 0 : i32
    %c0_i32_0 = arith.constant 0 : i32
    return %arg0, %c0_i32 : i32, i32
  }
}

</mosaic_0001>

<bundles_post_ra>
// kernel: tpu_custom_call.1
= control target key start
LH: loop header
LB: loop body
LE: loop exit
PB: predicated region body
PF: predicated region fallthrough
CT: control target
= control target key end

     0   :  { %s549_s0 = inlined_call_operand.<no memory space> [shape: f32[1], index: 0, kind: input, shape index: {}]   ;;  %s550_s1 = inlined_call_operand.<no memory space> [shape: f32[1], index: 1, kind: input, shape index: {}]   ;;  %s551_s2 = inlined_call_operand.hbm [shape: f32[16,128], index: 2, kind: input, shape index: {}]   ;;  %s552_s3 = inlined_call_operand.hbm [shape: f32[16,128], index: 3, kind: output, shape index: {}]  }
   0x1   :  { %8 = sst [smem:[#allocation3]] %s549_s0 }
   0x2   :  { %9 = sst [smem:[#allocation4]] %s550_s1 }
   0x3   :  { %10 = vsyncpa [#allocation6], 0 }
   0x4   :  { %12 = vsyncpa [#allocation6 + $0x1], 0 }
   0x5   :  { %13 = vsyncpa [#allocation7], 0 }
   0x6   :  { %15 = vsyncpa [#allocation7 + $0x1], 0  ;;  %s408_s16 = smov 0   ;;  %s410_s17 = smov 0  }
   0x7   :  { %s412_s18 = smov 0   ;;  %s414_s19 = smov 0  }
   0x8 LB: > { %s429_s0 = sadd.s32 4294967295, %s378_s19   ;;  %s228_s1 = sadd.s32 4294967294, %s378_s19   ;;  %s378_s19 = sphi %s414_s19, %s569_s19   ;;  %s374_s18 = sphi %s412_s18, %s568_s18   ;;  %s370_s17 = sphi %s410_s17, %s567_s17   ;;  %s366_s16 = sphi %s408_s16, %s566_s16  }
   0x9   : > { %s433_s20 = sadd.s32 1, %s378_s19   ;;  %s28_s21 = sadd.s32 1, %s374_s18 }
   0xa   : > { %s25_s22 = ssub.s32 %s378_s19, %s433_s20  ;;  %p35_p0 = scmp.ne.s32.totalorder %s374_s18, %s370_s17 }
   0xb   : > { %p26_p1 = scmp.eq.s32.totalorder %s25_s22, 0  ;;  %p36_p2 = scmp.eq.s32.totalorder %s378_s19, 0 }
   0xc   : > { %p41_p3 = scmp.ne.s32.totalorder %s370_s17, %s366_s16  ;;  %p42_p4 = scmp.eq.s32.totalorder %s429_s0, 0 }
   0xd   : > { %s445_s23 = scalar_select %p26_p1, %s374_s18, %s28_s21  }
   0xe   : > { %p447_p5 = por %p36_p2, %p35_p0  ;;  %p451_p6 = por %p42_p4, %p41_p3 }
   0xf   : > { %p65_p7 = scmp.eq.s32.totalorder %s429_s0, 1  ;;  %p71_p8 = scmp.eq.s32.totalorder %s228_s1, 1 }
  0x10   : > { %s556_s25 = scalar_select %p451_p6, 1, 0 }
  0x11   : > { %p252_p10 = scmp.lt.s32.totalorder %s378_s19, 2  ;;  %p458_p11 = por %p65_p7, %p35_p0 }
  0x12   : > { %p462_p12 = por %p71_p8, %p41_p3  ;;  %s91_s28 = sand.u32 1, %s374_s18  }
  0x13   : > { %s557_s26 = scalar_select %p458_p11, 1, 0 }
  0x14   : > { %s558_s27 = scalar_select %p462_p12, 1, 0 }
  0x15   : > { %s232_s29 = sshll.u32 %s378_s19, 7  ;;  %s231_s30 = sshll.u32 %s91_s28, 3 }
  0x16   : > { %s471_s6 = scalar_lea.hbm %s551_s2, %s232_s29  ;;  %s95_s7 = scalar_lea.vmem [#allocation5], %s231_s30 }
  0x17   : > { %s102_s8 = sshll.u32 %s95_s7, 4  ;;  %p475_p13 = pnand %p252_p10, %p447_p5  ;;  %s479_s8 = int_to_ptr.vmem [resolvable:$true] %s102_s8 }
  0x18   : > { %s92_s10 = scalar_lea.sflag [#allocation6], %s91_s28  ;;  %s286_s11 = scalar_lea.hbm %s471_s6, 128 }
  0x19   : > { %p287_p2 = scmp.ne.s32.totalorder %s471_s6, %s286_s11  ;;  %p288_p3 = pneg %p475_p13 }
  0x1a   : > { %s291_s14 = scalar_lea.hbm %s551_s2, 256  ;;  %p292_p5 = scmp.lt.s32.totalorder %s471_s6, %s551_s2 }
  0x1b   : > { %p289_p4 = pnand %p288_p3, %p287_p2  ;;  %p293_p8 = scmp.lt.s32.totalorder %s291_s14, %s286_s11 }
  0x1d   : > { %p290_p7 = pneg %p289_p4  ;;  %p294_p10 = por %p293_p8, %p292_p5 }
  0x1f   : > { %p295_p9 = pnand %p294_p10, %p290_p7 }
  0x21   : > { %298 = shalt.err (!%p295_p9)
}
  0x22   : > { %s299_s21 = scalar_lea.vmem %s479_s8, 128  ;;  %s380_s22 = smov [#allocation5]  }
  0x23   : > { %p300_p0 = scmp.ne.s32.totalorder %s479_s8, %s299_s21  ;;  %s304_s24 = sshll.u32 %s380_s22, 4  ;;  %s305_s24 = int_to_ptr.vmem [resolvable:$false] %s304_s24 }
  0x24   : > { %s306_s28 = scalar_lea.vmem %s305_s24, 256  ;;  %p307_p4 = scmp.lt.s32.totalorder %s479_s8, %s305_s24 }
  0x25   : > { %p302_p1 = pnand %p300_p0, %p288_p3  ;;  %p308_p12 = scmp.lt.s32.totalorder %s306_s28, %s299_s21 }
  0x27   : > { %p303_p2 = pneg %p302_p1  ;;  %p309_p11 = por %p308_p12, %p307_p4 }
  0x29   : > { %p310_p6 = pnand %p309_p11, %p303_p2 }
  0x2b   : > { %313 = shalt.err (!%p310_p6)
}
  0x2c   : > { %247 = dma.hbm_to_vmem [thread:$0]  (!%p475_p13), %s471_s6, 128, %s479_s8, %s92_s10  }
  0x2d   : > { %p560_p9 = scmp.lt.s32.totalorder %s378_s19, 3  ;;  %p561_p7 = scmp.ge.s32.totalorder %s378_s19, 1 }
  0x2f   : > { %p108_p0 = pnand %p561_p7, %p560_p9 }
  0x30   : > { %s506_s29 = sand.u32 (!%p108_p0), 1, %s370_s17   ;;  %p562_p6 = scmp.ne.s32.totalorder (!%p108_p0), %s556_s25, 0 }
  0x31   : > { %111 = sbr.rel (%p108_p0) target bundleno = 81 (0x51), region = 24  ;;  %s234_s30 = sshll.u32 (!%p108_p0), %s506_s29, 3 }
  0x32   : > { %s114_s4 = scalar_lea.sflag (!%p108_p0), [#allocation6], %s506_s29  ;;  %s117_s5 = scalar_lea.vmem (!%p108_p0), [#allocation5], %s234_s30 }
  0x36   : > { %357 = dma.done.wait (%p562_p6), %s114_s4, 128  }
  0x37   : > { %359 = vsyncadd (%p562_p6), %s114_s4, 4294967168  ;;  %s136_s6 = sld [smem:[#allocation3]]  ;;  %v138_v0 = vld [vmem:[%s117_s5] sm:$0xff]  ;;  %s135_s8 = scalar_lea.vmem [#allocation8], %s234_s30 }
  0x38   : > { %s137_s7 = sld [smem:[#allocation4]]  ;;  %s158_s9 = sshll.u32 %s135_s8, 4  ;;  %s159_s9 = int_to_ptr.vmem [resolvable:$true] %s158_s9 }
  0x39   : > { %s237_s10 = sshll.u32 %s429_s0, 7  ;;  %s145_s25 = scalar_lea.sflag [#allocation7], %s506_s29 }
  0x3a   : > { %s156_s13 = scalar_lea.hbm %s552_s3, %s237_s10  ;;  %s314_s14 = scalar_lea.vmem %s159_s9, 128 }
  0x3b   : > { %p315_p11 = scmp.ne.s32.totalorder %s159_s9, %s314_s14  ;;  %p563_p12 = scmp.ne.s32.totalorder %s557_s26, 0 }
  0x3c   : > { %s381_s15 = smov [#allocation8]  }
  0x3d   : > { %v139_v1 = vstv %s136_s6  ;;  %p316_p13 = pnand %p315_p11, %p563_p12  ;;  %s318_s1 = sshll.u32 %s381_s15, 4  ;;  %s319_s1 = int_to_ptr.vmem [resolvable:$false] %s318_s1 }
  0x3e   : > { %v140_v2 = vmul.f32 %v139_v1, %v138_v0  ;;  %v141_v3 = vstv %s137_s7  ;;  %s320_s21 = scalar_lea.vmem %s319_s1, 256  ;;  %p321_p3 = scmp.lt.s32.totalorder %s159_s9, %s319_s1 }
  0x3f   : > { %p317_p1 = pneg %p316_p13  ;;  %p322_p5 = scmp.lt.s32.totalorder %s320_s21, %s314_s14 }
  0x40   : > { %v142_v4 = vadd.f32 %v141_v3, %v140_v2 }
  0x41   : > { %p323_p8 = por %p322_p5, %p321_p3 }
  0x42   : > { %143 = vst [vmem:[%s135_s8] sm:$0xff] %v142_v4 }
  0x43   : > { %p324_p10 = pnand %p323_p8, %p317_p1 }
  0x45   : > { %327 = shalt.err (!%p324_p10)
}
  0x46   : > { %s328_s0 = scalar_lea.hbm %s156_s13, 128  ;;  %s332_s28 = scalar_lea.hbm %s552_s3, 256 }
  0x47   : > { %p329_p2 = scmp.ne.s32.totalorder %s156_s13, %s328_s0  ;;  %p333_p7 = scmp.lt.s32.totalorder %s156_s13, %s552_s3 }
  0x48   : > { %p334_p0 = scmp.lt.s32.totalorder %s332_s28, %s328_s0 }
  0x49   : > { %p330_p4 = pnand %p329_p2, %p563_p12 }
  0x4a   : > { %p335_p6 = por %p334_p0, %p333_p7 }
  0x4b   : > { %p331_p9 = pneg %p330_p4 }
  0x4d   : > { %p336_p11 = pnand %p335_p6, %p331_p9 }
  0x4f   : > { %339 = shalt.err (!%p336_p11)
}
  0x50   : > { %242 = dma.vmem_to_hbm [thread:$0]  (%p563_p12), %s159_s9, 128, %s156_s13, %s145_s25  }
  0x51 PF: > { %s170_s4 = sand.u32 1, %s366_s16   ;;  %p564_p13 = scmp.ne.s32.totalorder %s558_s27, 0 }
  0x52   : > { %p565_p1 = scmp.ge.s32.totalorder %s378_s19, 2  ;;  %s171_s5 = scalar_lea.sflag [#allocation7], %s170_s4 }
  0x54   : > { %p249_p3 = pnand %p565_p1, %p564_p13 }
  0x56   : > { %p250_p5 = pneg %p249_p3 }
  0x58   : > { %361 = dma.done.wait (%p250_p5), %s171_s5, 128  }
  0x59   : > { %363 = vsyncadd (%p250_p5), %s171_s5, 4294967168  ;;  %p18_p8 = scmp.ge.s32.totalorder %s433_s20, 4   ;;  %s566_s16 = smov %s370_s17 }
  0x5a   : > { %s567_s17 = smov %s374_s18  ;;  %s568_s18 = smov %s445_s23 }
  0x5b   : > { %s569_s19 = smov %s433_s20  ;;  %20 = sbr.rel (!%p18_p8) target bundleno = 8 (0x8), region = 69 }
  0x60   :  { %176 = vsyncpa [#allocation6], 1 }
  0x61   :  { %178 = vsyncpa [#allocation6 + $0x1], 1 }
  0x62   :  { %179 = vsyncpa [#allocation7], 1 }
  0x63   :  { %181 = vsyncpa [#allocation7 + $0x1], 1 }

</bundles_post_ra>
